<compile_context>
chip_gen: v5e
topology: v5e:2x2
jax: 0.10.0
libtpu: 0.0.40
codegen_flags: <defaults>
</compile_context>

<pallas_src>
import functools

import jax
import jax.numpy as jnp
from jax.experimental import pallas as pl
from jax.experimental.pallas import tpu as pltpu

HIDDEN = 256


def _round_up(n, m):
    return ((n + m - 1) // m) * m


def _cdiv(a, b):
    return (a + b - 1) // b


def qnetwork_kernel(x_ref, w1_ref, b1_ref, w2_ref, b2_ref, w3_ref, b3_ref, o_ref):
    # Cast activations to the matmul dtype *inside* the kernel; K=32 costs the
    # same number of MXU passes as K=128, so there is no compute penalty.
    x = x_ref[...].astype(w1_ref.dtype)
    # fc1 + relu (bf16 matmul operands, f32 accumulate, f32 elementwise)
    h1 = jnp.dot(x, w1_ref[...], preferred_element_type=jnp.float32)
    h1 = jnp.maximum(h1 + b1_ref[...], 0.0)
    # fc2 + relu
    h2 = jnp.dot(h1.astype(w2_ref.dtype), w2_ref[...],
                 preferred_element_type=jnp.float32)
    h2 = jnp.maximum(h2 + b2_ref[...], 0.0)
    # fc3 (no activation) -> compact (tm, out_size) output block
    out = jnp.dot(h2.astype(w3_ref.dtype), w3_ref[...],
                  preferred_element_type=jnp.float32)
    o_ref[...] = (out + b3_ref[...]).astype(o_ref.dtype)


def prepare_params(params, *, use_bf16=True):
    """One-time parameter prep, hoisted out of the per-call path.

    Weights (stored as (in, out)) cast to the MXU matmul dtype; biases kept f32
    and reshaped to (1, n) for in-kernel broadcast.
    """
    mm = jnp.bfloat16 if use_bf16 else jnp.float32
    return {
        "w1": params["w1"].astype(mm),
        "b1": params["b1"].astype(jnp.float32).reshape(1, -1),
        "w2": params["w2"].astype(mm),
        "b2": params["b2"].astype(jnp.float32).reshape(1, -1),
        "w3": params["w3"].astype(mm),
        "b3": params["b3"].astype(jnp.float32).reshape(1, -1),
    }


def _choose_batch_tiling(B, block_m):
    """Pick (tile_m, padded_B, n_steps) minimizing padded-row waste while
    guaranteeing enough grid depth for pipelining / v7x 2-TC sharding."""
    # Cap tile so double-buffered x/out + resident weights + f32 h1/h2
    # intermediates stay well under the default scoped VMEM (and v7x's 64 MiB).
    block_m = min(block_m, 4096)
    n = _cdiv(B, block_m)
    if B >= 512:
        n = max(n, 4)     # both v7x TCs busy + deep enough pipeline
    elif B >= 64:
        n = max(n, 2)     # at least prologue/epilogue DMA overlap
    tm = _round_up(_cdiv(B, n), 16)   # 16-row alignment (bf16 sublane packing)
    return tm, n * tm, n


@functools.partial(jax.jit, static_argnames=("block_m",))
def qnetwork_forward(x, prepared, *, block_m=2048):
    """x: (B, input_size) f32. prepared: output of prepare_params()."""
    w1, b1 = prepared["w1"], prepared["b1"]
    w2, b2 = prepared["w2"], prepared["b2"]
    w3, b3 = prepared["w3"], prepared["b3"]

    B, in_size = x.shape
    hidden = w1.shape[1]
    out_size = w3.shape[1]

    tm, b_p, n_steps = _choose_batch_tiling(B, block_m)
    if b_p != B:
        x = jnp.pad(x, ((0, b_p - B), (0, 0)))   # batch-axis pad only

    const_spec = lambda arr: pl.BlockSpec(arr.shape, lambda i: (0, 0))

    itemsize = lambda a: a.size * a.dtype.itemsize
    flops = 2 * b_p * (in_size * hidden + hidden * hidden + hidden * out_size)
    bytes_accessed = (b_p * in_size * x.dtype.itemsize
                      + itemsize(w1) + itemsize(w2) + itemsize(w3)
                      + itemsize(b1) + itemsize(b2) + itemsize(b3)
                      + b_p * out_size * 4)

    out = pl.pallas_call(
        qnetwork_kernel,
        out_shape=jax.ShapeDtypeStruct((b_p, out_size), jnp.float32),
        grid=(n_steps,),
        in_specs=[
            # x: batch-tiled, full (unpadded) feature dim — legal since the
            # block equals the array dim on the last axis.
            pl.BlockSpec((tm, in_size), lambda i: (i, 0)),
            # Weights/biases: constant index_map -> VMEM-resident across steps.
            const_spec(w1), const_spec(b1),
            const_spec(w2), const_spec(b2),
            const_spec(w3), const_spec(b3),
        ],
        # Compact output block: HBM side of the DMA stays contiguous.
        out_specs=pl.BlockSpec((tm, out_size), lambda i: (i, 0)),
        compiler_params=pltpu.CompilerParams(
            dimension_semantics=("parallel",)),   # v7x: shard batch over 2 TCs
        cost_estimate=pl.CostEstimate(
            flops=flops, transcendentals=0, bytes_accessed=bytes_accessed),
    )(x, w1, b1, w2, b2, w3, b3)

    if b_p != B:
        out = out[:B]
    return out


def init_params(key, input_size, output_size, hidden=HIDDEN):
    """Deterministic synthetic init (shapes match the PyTorch module)."""
    ks = jax.random.split(key, 6)
    # Stored as (in, out) so kernel computes x @ W + b (== torch x @ weight.T + bias)
    w1 = jax.random.normal(ks[0], (input_size, hidden), jnp.float32) * 0.05
    b1 = jax.random.normal(ks[1], (hidden,), jnp.float32) * 0.05
    w2 = jax.random.normal(ks[2], (hidden, hidden), jnp.float32) * 0.05
    b2 = jax.random.normal(ks[3], (hidden,), jnp.float32) * 0.05
    w3 = jax.random.normal(ks[4], (hidden, output_size), jnp.float32) * 0.05
    b3 = jax.random.normal(ks[5], (output_size,), jnp.float32) * 0.05
    return {"w1": w1, "b1": b1, "w2": w2, "b2": b2, "w3": w3, "b3": b3}


def reference_forward(x, p):
    h1 = jnp.maximum(x @ p["w1"] + p["b1"], 0.0)
    h2 = jnp.maximum(h1 @ p["w2"] + p["b2"], 0.0)
    return h2 @ p["w3"] + p["b3"]


if __name__ == "__main__":
    key = jax.random.PRNGKey(0)
    batch, input_size, output_size = 8, 32, 8

    k_x, k_p = jax.random.split(key)
    x = jax.random.normal(k_x, (batch, input_size), jnp.float32)
    params = init_params(k_p, input_size, output_size)

    # One-time weight prep (outside the jitted per-call path).
    prepared_bf16 = prepare_params(params, use_bf16=True)
    out = jax.block_until_ready(qnetwork_forward(x, prepared_bf16))
    ref = reference_forward(x, params)

    assert out.shape == (batch, output_size)
    # bf16 matmul operands with f32 accumulation: ~1e-2-level agreement.
    assert jnp.allclose(out, ref, atol=5e-2, rtol=5e-2), float(
        jnp.max(jnp.abs(out - ref)))

    # Exact-f32 path sanity check.
    prepared_f32 = prepare_params(params, use_bf16=False)
    out_f32 = jax.block_until_ready(qnetwork_forward(x, prepared_f32))
    assert jnp.allclose(out_f32, ref, atol=1e-4, rtol=1e-4), float(
        jnp.max(jnp.abs(out_f32 - ref)))

    print("KERNEL_OK")
</pallas_src>

<mosaic_0001>
module attributes {stable_mosaic.version = 11 : i64} {
  func.func @qnetwork_kernel(%arg0: i32, %arg1: memref<16x32xf32, #tpu.memory_space<vmem>>, %arg2: memref<32x256xbf16, #tpu.memory_space<vmem>>, %arg3: memref<1x256xf32, #tpu.memory_space<vmem>>, %arg4: memref<256x256xbf16, #tpu.memory_space<vmem>>, %arg5: memref<1x256xf32, #tpu.memory_space<vmem>>, %arg6: memref<256x8xbf16, #tpu.memory_space<vmem>>, %arg7: memref<1x8xf32, #tpu.memory_space<vmem>>, %arg8: memref<16x8xf32, #tpu.memory_space<vmem>>) attributes {dimension_semantics = [#tpu.dimension_semantics<parallel>], iteration_bounds = array<i64: 1>, scalar_prefetch = 0 : i64, scratch_operands = 0 : i64, tpu.core_type = #tpu.core_type<tc>, window_params = [{transform_indices = @transform_0, window_bounds = array<i64: 16, 32>}, {pipeline_mode = #tpu.pipeline_mode<synchronous>, transform_indices = @transform_1, window_bounds = array<i64: 32, 256>}, {pipeline_mode = #tpu.pipeline_mode<synchronous>, transform_indices = @transform_2, window_bounds = array<i64: 1, 256>}, {pipeline_mode = #tpu.pipeline_mode<synchronous>, transform_indices = @transform_3, window_bounds = array<i64: 256, 256>}, {pipeline_mode = #tpu.pipeline_mode<synchronous>, transform_indices = @transform_4, window_bounds = array<i64: 1, 256>}, {pipeline_mode = #tpu.pipeline_mode<synchronous>, transform_indices = @transform_5, window_bounds = array<i64: 256, 8>}, {pipeline_mode = #tpu.pipeline_mode<synchronous>, transform_indices = @transform_6, window_bounds = array<i64: 1, 8>}, {transform_indices = @transform_7, window_bounds = array<i64: 16, 8>}]} {
    %c0 = arith.constant 0 : index
    %c0_0 = arith.constant 0 : index
    %0 = vector.load %arg1[%c0, %c0_0] : memref<16x32xf32, #tpu.memory_space<vmem>>, vector<16x32xf32>
    %1 = arith.truncf %0 : vector<16x32xf32> to vector<16x32xbf16>
    %c0_1 = arith.constant 0 : index
    %c0_2 = arith.constant 0 : index
    %2 = vector.load %arg2[%c0_1, %c0_2] : memref<32x256xbf16, #tpu.memory_space<vmem>>, vector<32x256xbf16>
    %cst = arith.constant dense<0.000000e+00> : vector<16x256xf32>
    %3 = tpu.matmul %1, %2, %cst {dimension_numbers = #tpu.dot_dimension_numbers<[1], [0], [0], [1], [0, 0, 1, 1], [], []>} : vector<16x32xbf16>, vector<32x256xbf16>, vector<16x256xf32> -> vector<16x256xf32>
    %c0_3 = arith.constant 0 : index
    %c0_4 = arith.constant 0 : index
    %4 = vector.load %arg3[%c0_3, %c0_4] : memref<1x256xf32, #tpu.memory_space<vmem>>, vector<1x256xf32>
    %5 = vector.broadcast %4 : vector<1x256xf32> to vector<16x256xf32>
    %6 = arith.addf %3, %5 : vector<16x256xf32>
    %cst_5 = arith.constant 0.000000e+00 : f32
    %7 = vector.broadcast %cst_5 : f32 to vector<16x256xf32>
    %8 = arith.maximumf %6, %7 : vector<16x256xf32>
    %9 = arith.truncf %8 : vector<16x256xf32> to vector<16x256xbf16>
    %c0_6 = arith.constant 0 : index
    %c0_7 = arith.constant 0 : index
    %10 = vector.load %arg4[%c0_6, %c0_7] : memref<256x256xbf16, #tpu.memory_space<vmem>>, vector<256x256xbf16>
    %cst_8 = arith.constant dense<0.000000e+00> : vector<16x256xf32>
    %11 = tpu.matmul %9, %10, %cst_8 {dimension_numbers = #tpu.dot_dimension_numbers<[1], [0], [0], [1], [0, 0, 1, 1], [], []>} : vector<16x256xbf16>, vector<256x256xbf16>, vector<16x256xf32> -> vector<16x256xf32>
    %c0_9 = arith.constant 0 : index
    %c0_10 = arith.constant 0 : index
    %12 = vector.load %arg5[%c0_9, %c0_10] : memref<1x256xf32, #tpu.memory_space<vmem>>, vector<1x256xf32>
    %13 = vector.broadcast %12 : vector<1x256xf32> to vector<16x256xf32>
    %14 = arith.addf %11, %13 : vector<16x256xf32>
    %cst_11 = arith.constant 0.000000e+00 : f32
    %15 = vector.broadcast %cst_11 : f32 to vector<16x256xf32>
    %16 = arith.maximumf %14, %15 : vector<16x256xf32>
    %17 = arith.truncf %16 : vector<16x256xf32> to vector<16x256xbf16>
    %c0_12 = arith.constant 0 : index
    %c0_13 = arith.constant 0 : index
    %18 = vector.load %arg6[%c0_12, %c0_13] : memref<256x8xbf16, #tpu.memory_space<vmem>>, vector<256x8xbf16>
    %cst_14 = arith.constant dense<0.000000e+00> : vector<16x8xf32>
    %19 = tpu.matmul %17, %18, %cst_14 {dimension_numbers = #tpu.dot_dimension_numbers<[1], [0], [0], [1], [0, 0, 1, 1], [], []>} : vector<16x256xbf16>, vector<256x8xbf16>, vector<16x8xf32> -> vector<16x8xf32>
    %c0_15 = arith.constant 0 : index
    %c0_16 = arith.constant 0 : index
    %20 = vector.load %arg7[%c0_15, %c0_16] : memref<1x8xf32, #tpu.memory_space<vmem>>, vector<1x8xf32>
    %21 = vector.broadcast %20 : vector<1x8xf32> to vector<16x8xf32>
    %22 = arith.addf %19, %21 : vector<16x8xf32>
    %c0_17 = arith.constant 0 : index
    %c0_18 = arith.constant 0 : index
    %23 = vector.load %arg8[%c0_17, %c0_18] : memref<16x8xf32, #tpu.memory_space<vmem>>, vector<16x8xf32>
    tpu.vector_store %arg8[%c0_17, %c0_18], %22 {strides = array<i32>} : memref<16x8xf32, #tpu.memory_space<vmem>>, vector<16x8xf32>,
    return
  }
  func.func @transform_0(%arg0: i32) -> (i32, i32) {
    %c0_i32 = arith.constant 0 : i32
    %c0_i32_0 = arith.constant 0 : i32
    return %arg0, %c0_i32 : i32, i32
  }
  func.func @transform_1(%arg0: i32) -> (i32, i32) {
    %c0_i32 = arith.constant 0 : i32
    %c0_i32_0 = arith.constant 0 : i32
    %c0_i32_1 = arith.constant 0 : i32
    return %c0_i32, %c0_i32_0 : i32, i32
  }
  func.func @transform_2(%arg0: i32) -> (i32, i32) {
    %c0_i32 = arith.constant 0 : i32
    %c0_i32_0 = arith.constant 0 : i32
    %c0_i32_1 = arith.constant 0 : i32
    return %c0_i32, %c0_i32_0 : i32, i32
  }
  func.func @transform_3(%arg0: i32) -> (i32, i32) {
    %c0_i32 = arith.constant 0 : i32
    %c0_i32_0 = arith.constant 0 : i32
    %c0_i32_1 = arith.constant 0 : i32
    return %c0_i32, %c0_i32_0 : i32, i32
  }
  func.func @transform_4(%arg0: i32) -> (i32, i32) {
    %c0_i32 = arith.constant 0 : i32
    %c0_i32_0 = arith.constant 0 : i32
    %c0_i32_1 = arith.constant 0 : i32
    return %c0_i32, %c0_i32_0 : i32, i32
  }
  func.func @transform_5(%arg0: i32) -> (i32, i32) {
    %c0_i32 = arith.constant 0 : i32
    %c0_i32_0 = arith.constant 0 : i32
    %c0_i32_1 = arith.constant 0 : i32
    return %c0_i32, %c0_i32_0 : i32, i32
  }
  func.func @transform_6(%arg0: i32) -> (i32, i32) {
    %c0_i32 = arith.constant 0 : i32
    %c0_i32_0 = arith.constant 0 : i32
    %c0_i32_1 = arith.constant 0 : i32
    return %c0_i32, %c0_i32_0 : i32, i32
  }
  func.func @transform_7(%arg0: i32) -> (i32, i32) {
    %c0_i32 = arith.constant 0 : i32
    %c0_i32_0 = arith.constant 0 : i32
    return %arg0, %c0_i32 : i32, i32
  }
}

</mosaic_0001>

<bundles_post_ra>
// kernel: qnetwork_forward.1
= control target key start
LH: loop header
LB: loop body
LE: loop exit
PB: predicated region body
PF: predicated region fallthrough
CT: control target
= control target key end

     0   :  { %12 = vsyncpa [#allocation3], 0  ;;  %s834_s27 = smov [#allocation2]   ;;  %s835_s29 = smov 128   ;;  %s975_s0 = inlined_call_operand.vmem [shape: f32[16,32], index: 0, kind: input, shape index: {}]   ;;  %s976_s1 = inlined_call_operand.vmem [shape: bf16[32,256], index: 1, kind: input, shape index: {}]   ;;  %s977_s2 = inlined_call_operand.vmem [shape: f32[1,256], index: 2, kind: input, shape index: {}]   ;;  %s978_s3 = inlined_call_operand.hbm [shape: bf16[256,256], index: 3, kind: input, shape index: {}]   ;;  %s979_s4 = inlined_call_operand.vmem [shape: f32[1,256], index: 4, kind: input, shape index: {}]   ;;  %s980_s5 = inlined_call_operand.vmem [shape: bf16[256,8], index: 5, kind: input, shape index: {}]   ;;  %s981_s6 = inlined_call_operand.vmem [shape: f32[1,8], index: 6, kind: input, shape index: {}]   ;;  %s982_s7 = inlined_call_operand.vmem [shape: f32[16,8], index: 7, kind: output, shape index: {}]  }
   0x1   :  { %s23_s26 = sshll.u32 %s978_s3, 4  ;;  %s25_s28 = sshll.u32 %s834_s27, 4  ;;  %s24_s26 = int_to_ptr.hbm [resolvable:$true] %s23_s26  ;;  %s26_s28 = int_to_ptr.vmem [resolvable:$true] %s25_s28 }
   0x2   :  { %s836_s30 = smov 8  }
   0x3   :  { %31 = dma.hbm_to_vmem [thread:$0]  %s24_s26, 4096, %s26_s28, [#allocation3], %s835_s29, %s835_s29, %s836_s30  }
   0x4   :  { %832 = dma.done.wait [#allocation3], 4096  }
   0x5   :  { %833 = vsyncadd [#allocation3], 4294963200  ;;  %v552_v0 = vld [vmem:[%s976_s1 + $0x10] sm:$0xf]  ;;  %v755_v1 = vld [vmem:[%s976_s1 + $0x14] sm:$0xf0] }
   0x6   :  { %v754_v2 = vld [vmem:[%s976_s1 + $0x14] sm:$0xf]  ;;  %v553_v3 = vor.u32 %v755_v1, %v552_v0  ;;  %v554_v4 = vld [vmem:[%s976_s1 + $0x18] sm:$0xf0]  ;;  %v544_v5 = vld [vmem:[%s976_s1] sm:$0xf] }
   0x7   :  { %v753_v6 = vld [vmem:[%s976_s1 + $0x4] sm:$0xf0]  ;;  %v557_v7 = vor.u32 %v754_v2, %v554_v4  ;;  %v752_v8 = vld [vmem:[%s976_s1 + $0x4] sm:$0xf]  ;;  %v546_v9 = vld [vmem:[%s976_s1 + $0x8] sm:$0xf0] }
   0x8   :  { %v43_v10 = vld [vmem:[%s975_s0] sm:$0xff]  ;;  %86 = vmatpush.bf16.msra.mxu0 %v553_v3  ;;  %v545_v11 = vor.u32 %v753_v6, %v544_v5  ;;  %v44_v12 = vld [vmem:[%s975_s0 + $0x8] sm:$0xff]  ;;  %vm76_vm0 = vcmask 261120   ;;  %v618_v13 = vld [vmem:[#allocation2 + $0x70] sm:$0xf]  ;;  %v549_v15 = vor.u32 %v752_v8, %v546_v9  ;;  %vm534_vm1 = vcmask 64512  }
   0x9   :  { %v771_v14 = vld [vmem:[#allocation2 + $0x74] sm:$0xf0]  ;;  %100 = vmatpush.bf16.msra.mxu1 %v557_v7  ;;  %v682_v17 = vld [vmem:[#allocation2 + $0xf0] sm:$0xf]  ;;  %v770_v19 = vld [vmem:[#allocation2 + $0x74] sm:$0xf]  ;;  %v45_v24 = vpack.c.bf16 %v44_v12, %v43_v10 }
   0xa   :  { %v619_v16 = vor.u32 %v771_v14, %v618_v13  ;;  %v787_v18 = vld [vmem:[#allocation2 + $0xf4] sm:$0xf0]  ;;  %v620_v21 = vld [vmem:[#allocation2 + $0x78] sm:$0xf0]  ;;  %v786_v22 = vld [vmem:[#allocation2 + $0xf4] sm:$0xf] }
   0xb   :  { %v683_v20 = vor.u32 %v787_v18, %v682_v17  ;;  %v684_v23 = vld [vmem:[#allocation2 + $0xf8] sm:$0xf0]  ;;  %v623_v25 = vor.u32 %v770_v19, %v620_v21  ;;  %v610_v27 = vld [vmem:[#allocation2 + $0x60] sm:$0xf]  ;;  %v769_v28 = vld [vmem:[#allocation2 + $0x64] sm:$0xf0] }
   0xc   :  { %312 = vmatpush.bf16.msra.mxu2 %v619_v16  ;;  %v687_v26 = vor.u32 %v786_v22, %v684_v23  ;;  %v674_v29 = vld [vmem:[#allocation2 + $0xe0] sm:$0xf]  ;;  %87 = vmatpush.bf16.msra.mxu0 %v545_v11  ;;  %v611_v30 = vor.u32 %v769_v28, %v610_v27  ;;  %v785_v31 = vld [vmem:[#allocation2 + $0xe4] sm:$0xf0]  ;;  %v768_v32 = vld [vmem:[#allocation2 + $0x64] sm:$0xf] }
   0xd   :  { %326 = vmatpush.bf16.msra.mxu3 %v683_v20  ;;  %v612_v33 = vld [vmem:[#allocation2 + $0x68] sm:$0xf0]  ;;  %101 = vmatpush.bf16.msra.mxu1 %v549_v15  ;;  %v675_v34 = vor.u32 %v785_v31, %v674_v29  ;;  %v784_v36 = vld [vmem:[#allocation2 + $0xe4] sm:$0xf]  ;;  %v602_v38 = vld [vmem:[#allocation2 + $0x50] sm:$0xf] }
   0xe   :  { %v615_v35 = vor.u32 %v768_v32, %v612_v33  ;;  %v676_v37 = vld [vmem:[#allocation2 + $0xe8] sm:$0xf0]  ;;  %v767_v40 = vld [vmem:[#allocation2 + $0x54] sm:$0xf0]  ;;  %v666_v41 = vld [vmem:[#allocation2 + $0xd0] sm:$0xf] }
   0xf   :  { %v679_v39 = vor.u32 %v784_v36, %v676_v37  ;;  %v783_v42 = vld [vmem:[#allocation2 + $0xd4] sm:$0xf0]  ;;  %558 = vmatmul.msk.bf16.vlgmr.msra.gmra.mxu0 %vm76_vm0, %v45_v24  ;;  %v603_v43 = vor.u32 %v767_v40, %v602_v38  ;;  %v766_v44 = vld [vmem:[#allocation2 + $0x54] sm:$0xf]  ;;  %v604_v45 = vld [vmem:[#allocation2 + $0x58] sm:$0xf0] }
  0x10   :  { %340 = vmatpush.bf16.msrb.mxu0 %v623_v25  ;;  %313 = vmatpush.bf16.msra.mxu2 %v611_v30  ;;  %v782_v46 = vld [vmem:[#allocation2 + $0xd4] sm:$0xf]  ;;  %v667_v47 = vor.u32 %v783_v42, %v666_v41  ;;  %v668_v48 = vld [vmem:[#allocation2 + $0xd8] sm:$0xf0]  ;;  %v594_v49 = vld [vmem:[#allocation2 + $0x40] sm:$0xf]  ;;  %v607_v51 = vor.u32 %v766_v44, %v604_v45 }
  0x11   :  { %354 = vmatpush.bf16.msrb.mxu1 %v687_v26  ;;  %327 = vmatpush.bf16.msra.mxu3 %v675_v34  ;;  %v765_v50 = vld [vmem:[#allocation2 + $0x44] sm:$0xf0]  ;;  %v658_v52 = vld [vmem:[#allocation2 + $0xc0] sm:$0xf]  ;;  %v671_v54 = vor.u32 %v782_v46, %v668_v48  ;;  %v764_v55 = vld [vmem:[#allocation2 + $0x44] sm:$0xf] }
  0x12   :  { %559 = vmatmul.msk.bf16.vlgmr.msra.gmra.mxu1 %vm76_vm0, %v45_v24  ;;  %v781_v53 = vld [vmem:[#allocation2 + $0xc4] sm:$0xf0]  ;;  %v596_v56 = vld [vmem:[#allocation2 + $0x48] sm:$0xf0]  ;;  %v595_v57 = vor.u32 %v765_v50, %v594_v49  ;;  %v780_v58 = vld [vmem:[#allocation2 + $0xc4] sm:$0xf] }
  0x13   :  { %v660_v59 = vld [vmem:[#allocation2 + $0xc8] sm:$0xf0]  ;;  %v659_v60 = vor.u32 %v781_v53, %v658_v52  ;;  %v599_v61 = vor.u32 %v764_v55, %v596_v56  ;;  %v586_v63 = vld [vmem:[#allocation2 + $0x30] sm:$0xf]  ;;  %v763_v0 = vld [vmem:[#allocation2 + $0x34] sm:$0xf0] }
  0x14   :  { %341 = vmatpush.bf16.msrb.mxu0 %v615_v35  ;;  %314 = vmatpush.bf16.msra.mxu2 %v603_v43  ;;  %v663_v62 = vor.u32 %v780_v58, %v660_v59  ;;  %v650_v1 = vld [vmem:[#allocation2 + $0xb0] sm:$0xf]  ;;  %v587_v2 = vor.u32 %v763_v0, %v586_v63  ;;  %v779_v3 = vld [vmem:[#allocation2 + $0xb4] sm:$0xf0]  ;;  %v762_v4 = vld [vmem:[#allocation2 + $0x34] sm:$0xf] }
  0x15   :  { %355 = vmatpush.bf16.msrb.mxu1 %v679_v39  ;;  %328 = vmatpush.bf16.msra.mxu3 %v667_v47  ;;  %v588_v5 = vld [vmem:[#allocation2 + $0x38] sm:$0xf0]  ;;  %v651_v6 = vor.u32 %v779_v3, %v650_v1  ;;  %v778_v8 = vld [vmem:[#allocation2 + $0xb4] sm:$0xf]  ;;  %v578_v11 = vld [vmem:[#allocation2 + $0x20] sm:$0xf] }
  0x16   :  { %v591_v7 = vor.u32 %v762_v4, %v588_v5  ;;  %v652_v9 = vld [vmem:[#allocation2 + $0xb8] sm:$0xf0]  ;;  %v761_v12 = vld [vmem:[#allocation2 + $0x24] sm:$0xf0]  ;;  %v642_v14 = vld [vmem:[#allocation2 + $0xa0] sm:$0xf] }
  0x17   :  { %v655_v10 = vor.u32 %v778_v8, %v652_v9  ;;  %v579_v13 = vor.u32 %v761_v12, %v578_v11  ;;  %v777_v15 = vld [vmem:[#allocation2 + $0xa4] sm:$0xf0]  ;;  %v760_v16 = vld [vmem:[#allocation2 + $0x24] sm:$0xf]  ;;  %v580_v18 = vld [vmem:[#allocation2 + $0x28] sm:$0xf0] }
  0x18   :  { %342 = vmatpush.bf16.msrb.mxu0 %v607_v51  ;;  %315 = vmatpush.bf16.msra.mxu2 %v595_v57  ;;  %v643_v17 = vor.u32 %v777_v15, %v642_v14  ;;  %v776_v19 = vld [vmem:[#allocation2 + $0xa4] sm:$0xf]  ;;  %v644_v20 = vld [vmem:[#allocation2 + $0xa8] sm:$0xf0]  ;;  %v583_v21 = vor.u32 %v760_v16, %v580_v18  ;;  %v570_v23 = vld [vmem:[#allocation2 + $0x10] sm:$0xf] }
  0x19   :  { %356 = vmatpush.bf16.msrb.mxu1 %v671_v54  ;;  %329 = vmatpush.bf16.msra.mxu3 %v659_v60  ;;  %v647_v22 = vor.u32 %v776_v19, %v644_v20  ;;  %v759_v24 = vld [vmem:[#allocation2 + $0x14] sm:$0xf0]  ;;  %v634_v25 = vld [vmem:[#allocation2 + $0x90] sm:$0xf]  ;;  %v758_v28 = vld [vmem:[#allocation2 + $0x14] sm:$0xf] }
  0x1a   :  { %v571_v26 = vor.u32 %v759_v24, %v570_v23  ;;  %v775_v27 = vld [vmem:[#allocation2 + $0x94] sm:$0xf0]  ;;  %v572_v29 = vld [vmem:[#allocation2 + $0x18] sm:$0xf0]  ;;  %v774_v32 = vld [vmem:[#allocation2 + $0x94] sm:$0xf] }
  0x1b   :  { %v635_v30 = vor.u32 %v775_v27, %v634_v25  ;;  %v575_v31 = vor.u32 %v758_v28, %v572_v29  ;;  %v636_v33 = vld [vmem:[#allocation2 + $0x98] sm:$0xf0]  ;;  %v562_v35 = vld [vmem:[#allocation2] sm:$0xf]  ;;  %v757_v36 = vld [vmem:[#allocation2 + $0x4] sm:$0xf0] }
  0x1c   :  { %343 = vmatpush.bf16.msrb.mxu0 %v599_v61  ;;  %316 = vmatpush.bf16.msra.mxu2 %v587_v2  ;;  %v639_v34 = vor.u32 %v774_v32, %v636_v33  ;;  %v626_v37 = vld [vmem:[#allocation2 + $0x80] sm:$0xf]  ;;  %v563_v38 = vor.u32 %v757_v36, %v562_v35  ;;  %v773_v39 = vld [vmem:[#allocation2 + $0x84] sm:$0xf0]  ;;  %v756_v40 = vld [vmem:[#allocation2 + $0x4] sm:$0xf] }
  0x1d   :  { %357 = vmatpush.bf16.msrb.mxu1 %v663_v62  ;;  %330 = vmatpush.bf16.msra.mxu3 %v651_v6  ;;  %v564_v41 = vld [vmem:[#allocation2 + $0x8] sm:$0xf0]  ;;  %v627_v42 = vor.u32 %v773_v39, %v626_v37  ;;  %v772_v44 = vld [vmem:[#allocation2 + $0x84] sm:$0xf]  ;;  %v803_v47 = vld [vmem:[%s980_s5 + $0x78] sm:$0xff] }
  0x1e   :  { %v567_v43 = vor.u32 %v756_v40, %v564_v41  ;;  %v628_v45 = vld [vmem:[#allocation2 + $0x88] sm:$0xf0]  ;;  %v795_v48 = vld [vmem:[%s980_s5 + $0x38] sm:$0xff]  ;;  %v802_v49 = vld [vmem:[%s980_s5 + $0x70] sm:$0xff] }
  0x1f   :  { %v631_v46 = vor.u32 %v772_v44, %v628_v45  ;;  %v794_v50 = vld [vmem:[%s980_s5 + $0x30] sm:$0xff]  ;;  %v801_v51 = vld [vmem:[%s980_s5 + $0x68] sm:$0xff]  ;;  %v800_v52 = vld [vmem:[%s980_s5 + $0x60] sm:$0xff] }
  0x20   :  { %344 = vmatpush.bf16.msrb.mxu0 %v591_v7  ;;  %317 = vmatpush.bf16.msra.mxu2 %v579_v13  ;;  %v50_v53 = vld [vmem:[%s977_s2] sm:$0x3]  ;;  %v793_v6 = vld [vmem:[%s980_s5 + $0x28] sm:$0xff]  ;;  %v799_v7 = vld [vmem:[%s980_s5 + $0x58] sm:$0xff] }
  0x21   :  { %358 = vmatpush.bf16.msrb.mxu1 %v655_v10  ;;  %331 = vmatpush.bf16.msra.mxu3 %v643_v17  ;;  %v52_v56 = vperm.slane %v50_v53, 0  ;;  %v53_v57 = vperm.slane %v50_v53, 1  ;;  %v792_v8 = vld [vmem:[%s980_s5 + $0x20] sm:$0xff]  ;;  %v798_v9 = vld [vmem:[%s980_s5 + $0x50] sm:$0xff]  ;;  %v791_v10 = vld [vmem:[%s980_s5 + $0x18] sm:$0xff] }
  0x22   :  { %v797_v11 = vld [vmem:[%s980_s5 + $0x48] sm:$0xff]  ;;  %v790_v12 = vld [vmem:[%s980_s5 + $0x10] sm:$0xff]  ;;  %v796_v13 = vld [vmem:[%s980_s5 + $0x40] sm:$0xff] }
  0x23   :  { %v789_v14 = vld [vmem:[%s980_s5 + $0x8] sm:$0xff]  ;;  %v788_v15 = vld [vmem:[%s980_s5] sm:$0xff] }
  0x24   :  { %345 = vmatpush.bf16.msrb.mxu0 %v583_v21  ;;  %318 = vmatpush.bf16.msra.mxu2 %v571_v26  ;;  %v146_v16 = vld [vmem:[%s979_s4] sm:$0x3] }
  0x25   :  { %359 = vmatpush.bf16.msrb.mxu1 %v647_v22  ;;  %332 = vmatpush.bf16.msra.mxu3 %v635_v30  ;;  %v149_v18 = vperm.slane %v146_v16, 1  ;;  %v148_v22 = vperm.slane %v146_v16, 0  ;;  %v807_v41 = vld [vmem:[%s981_s6] ss:$0 sm:$0xff] }
  0x28   :  { %346 = vmatpush.bf16.msrb.mxu0 %v575_v31  ;;  %319 = vmatpush.bf16.msra.mxu2 %v563_v38 }
  0x29   :  { %360 = vmatpush.bf16.msrb.mxu1 %v639_v34  ;;  %333 = vmatpush.bf16.msra.mxu3 %v627_v42 }
  0x2c   :  { %347 = vmatpush.bf16.msrb.mxu0 %v567_v43  ;;  %506 = vmatpush.bf16.msrb.mxu2 %v795_v48 }
  0x2d   :  { %361 = vmatpush.bf16.msrb.mxu1 %v631_v46  ;;  %520 = vmatpush.bf16.msrb.mxu3 %v803_v47 }
  0x30   :  { %507 = vmatpush.bf16.msrb.mxu2 %v794_v50 }
  0x31   :  { %521 = vmatpush.bf16.msrb.mxu3 %v802_v49 }
  0x34   :  { %508 = vmatpush.bf16.msrb.mxu2 %v793_v6 }
  0x35   :  { %522 = vmatpush.bf16.msrb.mxu3 %v801_v51 }
  0x38   :  { %509 = vmatpush.bf16.msrb.mxu2 %v792_v8 }
  0x39   :  { %523 = vmatpush.bf16.msrb.mxu3 %v800_v52 }
  0x3c   :  { %510 = vmatpush.bf16.msrb.mxu2 %v791_v10 }
  0x3d   :  { %524 = vmatpush.bf16.msrb.mxu3 %v799_v7 }
  0x40   :  { %511 = vmatpush.bf16.msrb.mxu2 %v790_v12 }
  0x41   :  { %525 = vmatpush.bf16.msrb.mxu3 %v798_v9 }
  0x44   :  { %512 = vmatpush.bf16.msrb.mxu2 %v789_v14 }
  0x45   :  { %526 = vmatpush.bf16.msrb.mxu3 %v797_v11 }
  0x48   :  { %513 = vmatpush.bf16.msrb.mxu2 %v788_v15 }
  0x49   :  { %527 = vmatpush.bf16.msrb.mxu3 %v796_v13 }
  0x8c   :  { %v89_v54 = vpop.f32.mrf.mxu0 }
  0x8d   :  { %v90_v58 = vadd.f32 %v89_v54, %v52_v56 }
  0x8f   :  { %v103_v55 = vpop.f32.mrf.mxu1  ;;  %v108_v0 = vmax.f32 %v90_v58, 0.0 }
  0x90   :  { %v104_v59 = vadd.f32 %v103_v55, %v53_v57 }
  0x92   :  { %v109_v2 = vmax.f32 %v104_v59, 0.0 }
  0x94   :  { %v91_v60 = vpop.f32.mrf.mxu0 }
  0x95   :  { %v92_v61 = vadd.f32 %v91_v60, %v52_v56 }
  0x97   :  { %v105_v62 = vpop.f32.mrf.mxu1  ;;  %v110_v1 = vmax.f32 %v92_v61, 0.0 }
  0x98   :  { %v106_v63 = vadd.f32 %v105_v62, %v53_v57 }
  0x99   :  { %v112_v4 = vpack.c.bf16 %v110_v1, %v108_v0 }
  0x9a   :  { %v111_v3 = vmax.f32 %v106_v63, 0.0 }
  0x9b   :  { %320 = vmatmul.bf16.vlgmr.msra.gmra.mxu2 %v112_v4  ;;  %348 = vmatmul.bf16.vlgmr.msrb.gmra.mxu0 %v112_v4 }
  0x9c   :  { %v113_v5 = vpack.c.bf16 %v111_v3, %v109_v2 }
  0x9e   :  { %334 = vmatmul.bf16.vlgmr.msra.gmra.mxu3 %v113_v5  ;;  %362 = vmatmul.bf16.vlgmr.msrb.gmra.mxu1 %v113_v5 }
 0x118   :  { %v349_v17 = vpop.f32.mrf.mxu0 }
 0x119   :  { %v350_v20 = vadd.f32 %v349_v17, %v149_v18 }
 0x11b   :  { %v363_v19 = vpop.f32.mrf.mxu1 }
 0x11c   :  { %v364_v25 = vadd.f32 %v363_v19, %v350_v20 }
 0x11e   :  { %v321_v21 = vpop.f32.mrf.mxu2  ;;  %v369_v30 = vmax.f32 %v364_v25, 0.0 }
 0x11f   :  { %v322_v28 = vadd.f32 %v321_v21, %v148_v22 }
 0x120   :  { %v351_v24 = vpop.f32.mrf.mxu0 }
 0x121   :  { %v335_v23 = vpop.f32.mrf.mxu3  ;;  %v352_v26 = vadd.f32 %v351_v24, %v149_v18 }
 0x122   :  { %v336_v33 = vadd.f32 %v335_v23, %v322_v28 }
 0x123   :  { %v365_v27 = vpop.f32.mrf.mxu1 }
 0x124   :  { %v366_v29 = vadd.f32 %v365_v27, %v352_v26  ;;  %v368_v38 = vmax.f32 %v336_v33, 0.0 }
 0x126   :  { %v371_v31 = vmax.f32 %v366_v29, 0.0  ;;  %v323_v32 = vpop.f32.mrf.mxu2 }
 0x127   :  { %v324_v35 = vadd.f32 %v323_v32, %v148_v22 }
 0x128   :  { %v373_v34 = vpack.c.bf16 %v371_v31, %v369_v30 }
 0x129   :  { %v337_v36 = vpop.f32.mrf.mxu3 }
 0x12a   :  { %v338_v37 = vadd.f32 %v337_v36, %v324_v35  ;;  %528 = vmatmul.bf16.vlgmr.msrb.gmra.mxu3 %v373_v34 }
 0x12c   :  { %v370_v39 = vmax.f32 %v338_v37, 0.0 }
 0x12e   :  { %v372_v40 = vpack.c.bf16 %v370_v39, %v368_v38 }
 0x130   :  { %514 = vmatmul.bf16.vlgmr.msrb.gmra.mxu2 %v372_v40 }
 0x1ad   :  { %v529_v42 = vpop.f32.mrf.mxu3 }
 0x1b3   :  { %v515_v43 = vpop.f32.mrf.mxu2 }
 0x1b4   :  { %v516_v44 = vadd.f32 %v807_v41, %v515_v43 }
 0x1b5   :  { %v531_v48 = vpop.f32.mrf.mxu3 }
 0x1b6   :  { %v530_v45 = vadd.f32 %v529_v42, %v516_v44 }
 0x1b8   :  { %535 = vst.msk [vmem:[%s982_s7] sm:$0xff] %vm534_vm1, %v530_v45 }
 0x1bb   :  { %v517_v46 = vpop.f32.mrf.mxu2 }
 0x1bc   :  { %v518_v47 = vadd.f32 %v807_v41, %v517_v46 }
 0x1be   :  { %v532_v49 = vadd.f32 %v531_v48, %v518_v47 }
 0x1c0   :  { %536 = vst.msk [vmem:[%s982_s7 + $0x8] sm:$0xff] %vm534_vm1, %v532_v49 }
 0x1c1   :  { %541 = vsyncpa [#allocation3], 1 }

</bundles_post_ra>
